<compile_context>
chip_gen: v7x
topology: tpu7x:2x2x1
jax: 0.10.0
libtpu: 0.0.40
codegen_flags: <defaults>
</compile_context>

<pallas_src>
import functools
from typing import NamedTuple

import jax
import jax.numpy as jnp
from jax.experimental import pallas as pl
from jax.experimental.pallas import tpu as pltpu


def _round_up(x, m):
    return (x + m - 1) // m * m


def _tpu_generation():
    """Best-effort TPU generation (5, 6, 7, ...); defaults to 6 if unknown."""
    try:
        kind = jax.devices()[0].device_kind.lower()
    except Exception:
        return 6
    for g in (7, 6, 5, 4):
        if f"v{g}" in kind or f"tpu{g}" in kind:
            return g
    return 6


class MLPConfig(NamedTuple):
    cin: int
    cout: int
    cin_p: int
    cmid_p: int
    cout_p: int
    tk: int
    num_k: int
    tm: int
    resident: bool
    vmem_cap: int
    generation: int


# ---------------------------------------------------------------------------
# Kernels
# ---------------------------------------------------------------------------

def _mlp_kernel_resident(x_ref, w1_ref, b1_ref, w2_ref, b2_ref, o_ref):
    # Whole hidden dim resident in VMEM: single fused fc1 -> GELU -> fc2.
    h = jnp.dot(x_ref[...], w1_ref[...], preferred_element_type=jnp.float32)
    h = jax.nn.gelu(h + b1_ref[...], approximate=True)          # tanh -> EUP
    out = jnp.dot(h.astype(w2_ref.dtype), w2_ref[...],
                  preferred_element_type=jnp.float32)
    # drop_rate == 0.0 -> Dropout is Identity; nothing to apply.
    o_ref[...] = (out + b2_ref[...]).astype(o_ref.dtype)


def _mlp_kernel_tiled(x_ref, w1_ref, b1_ref, w2_ref, b2_ref, o_ref, acc_ref):
    # Grid: (token tiles [parallel], hidden slabs [arbitrary / reduction]).
    k = pl.program_id(1)

    h = jnp.dot(x_ref[...], w1_ref[...], preferred_element_type=jnp.float32)
    h = jax.nn.gelu(h + b1_ref[...], approximate=True)           # tanh -> EUP
    contrib = jnp.dot(h.astype(w2_ref.dtype), w2_ref[...],
                      preferred_element_type=jnp.float32)

    # First slab writes (no zero-fill store), later slabs accumulate.
    @pl.when(k == 0)
    def _first():
        acc_ref[...] = contrib

    @pl.when(k > 0)
    def _rest():
        acc_ref[...] += contrib

    @pl.when(k == pl.num_programs(1) - 1)
    def _finalize():
        o_ref[...] = (acc_ref[...] + b2_ref[...]).astype(o_ref.dtype)


# ---------------------------------------------------------------------------
# One-time parameter preparation (model-load time, NOT per call)
# ---------------------------------------------------------------------------

def prepare_mlp_params(w1, b1, w2, b2, *, tm=None, tk_hidden=512,
                       generation=None):
    """Pad + cast weights once; derive tiling config for the current TPU."""
    gen = _tpu_generation() if generation is None else generation
    Cin, Cmid = w1.shape
    Cmid2, Cout = w2.shape
    assert Cmid2 == Cmid

    # v6e/v7x MXU is 2x256^2 -> prefer 256-multiples when the real dim allows;
    # v5e (4x128^2) is fine at 128.
    def lane_mult(dim):
        return 256 if (gen >= 6 and dim >= 256) else 128

    Cin_p = _round_up(Cin, lane_mult(Cin))
    Cout_p = _round_up(Cout, lane_mult(Cout))
    mult_mid = lane_mult(Cmid)
    Cmid_p0 = _round_up(Cmid, mult_mid)

    # Token tile: generation-aware defaults (weight reuse vs HBM roofline).
    if tm is None:
        tm = 256 if gen >= 7 else 512

    # VMEM cap: 56 MiB only on v7x (64 MiB physical); ~100 MiB on v5e/v6e.
    vmem_cap = (56 << 20) if gen >= 7 else (100 << 20)

    # Weight-resident fast path: padded bf16 weights (+ f32 biases) fit VMEM.
    resident_bytes = Cmid_p0 * (Cin_p + Cout_p) * 2 + (Cmid_p0 + Cout_p) * 4
    resident_budget = (24 << 20) if gen >= 7 else (64 << 20)
    resident = resident_bytes <= resident_budget

    if resident:
        tk = Cmid_p0
        num_k = 1
        Cmid_p = Cmid_p0
    else:
        # Avoid over-padding: round Cmid to the lane multiple first, then pick
        # tk as the smallest lane-multiple covering it in num_k equal slabs.
        units = Cmid_p0 // mult_mid
        units_per_k = max(1, tk_hidden // mult_mid)
        num_k = -(-units // units_per_k)            # cdiv
        tk = -(-units // num_k) * mult_mid          # cdiv * lane multiple
        Cmid_p = tk * num_k

    # bf16 MXU operands (zero padding keeps results exact), f32 biases.
    w1p = jnp.zeros((Cin_p, Cmid_p), jnp.bfloat16).at[:Cin, :Cmid].set(
        w1.astype(jnp.bfloat16))
    w2p = jnp.zeros((Cmid_p, Cout_p), jnp.bfloat16).at[:Cmid, :Cout].set(
        w2.astype(jnp.bfloat16))
    b1p = jnp.zeros((1, Cmid_p), jnp.float32).at[0, :Cmid].set(
        b1.astype(jnp.float32))
    b2p = jnp.zeros((1, Cout_p), jnp.float32).at[0, :Cout].set(
        b2.astype(jnp.float32))

    cfg = MLPConfig(cin=Cin, cout=Cout, cin_p=Cin_p, cmid_p=Cmid_p,
                    cout_p=Cout_p, tk=tk, num_k=num_k, tm=tm,
                    resident=resident, vmem_cap=vmem_cap, generation=gen)
    return (w1p, b1p, w2p, b2p), cfg


# ---------------------------------------------------------------------------
# Per-call jitted forward
# ---------------------------------------------------------------------------

@functools.partial(jax.jit, static_argnames=("cfg",))
def _mlp_block_impl(x, w1p, b1p, w2p, b2p, cfg: MLPConfig):
    B, L, Cin = x.shape
    assert Cin == cfg.cin
    M = B * L
    gen = cfg.generation
    out_bytes = jnp.dtype(x.dtype).itemsize

    # Token tile selection (trace-time / static).
    tm = cfg.tm
    if gen >= 7 and _round_up(M, tm) // tm < 2 and M > 128:
        tm = 128            # make sure both v7x TensorCores get work
    if M < tm:
        tm = _round_up(M, 8)
    Mp = _round_up(M, tm)
    num_m = Mp // tm

    # Activation: pad/cast only when needed (no per-call weight traffic).
    x2d = x.reshape(M, Cin)
    if Mp == M and cfg.cin_p == Cin:
        x_in = x2d.astype(jnp.bfloat16)
    else:
        x_in = jnp.zeros((Mp, cfg.cin_p), jnp.bfloat16).at[:M, :Cin].set(
            x2d.astype(jnp.bfloat16))

    cost = pl.CostEstimate(
        flops=2 * Mp * cfg.cmid_p * (cfg.cin_p + cfg.cout_p),
        transcendentals=Mp * cfg.cmid_p,
        bytes_accessed=(Mp * cfg.cin_p * 2
                        + cfg.cmid_p * (cfg.cin_p + cfg.cout_p) * 2
                        + (cfg.cmid_p + cfg.cout_p) * 4
                        + Mp * cfg.cout_p * out_bytes))

    if cfg.resident:
        # Weights DMA'd once, single-buffered (constant block index).
        vmem_need = (2 * tm * cfg.cin_p * 2
                     + cfg.cin_p * cfg.cmid_p * 2
                     + cfg.cmid_p * cfg.cout_p * 2
                     + 2 * 8 * (cfg.cmid_p + cfg.cout_p) * 4
                     + 2 * tm * cfg.cout_p * out_bytes
                     + tm * cfg.cmid_p * 4
                     + tm * cfg.cout_p * 4)
        vmem_limit = int(min(max(2 * vmem_need, 32 << 20), cfg.vmem_cap))

        out2d = pl.pallas_call(
            _mlp_kernel_resident,
            out_shape=jax.ShapeDtypeStruct((Mp, cfg.cout_p), x.dtype),
            grid_spec=pltpu.PrefetchScalarGridSpec(
                num_scalar_prefetch=0,
                grid=(num_m,),
                in_specs=[
                    pl.BlockSpec((tm, cfg.cin_p), lambda i: (i, 0)),
                    pl.BlockSpec((cfg.cin_p, cfg.cmid_p), lambda i: (0, 0),
                                 pipeline_mode=pl.Buffered(1)),
                    pl.BlockSpec((1, cfg.cmid_p), lambda i: (0, 0)),
                    pl.BlockSpec((cfg.cmid_p, cfg.cout_p), lambda i: (0, 0),
                                 pipeline_mode=pl.Buffered(1)),
                    pl.BlockSpec((1, cfg.cout_p), lambda i: (0, 0)),
                ],
                out_specs=pl.BlockSpec((tm, cfg.cout_p), lambda i: (i, 0)),
                scratch_shapes=[],
            ),
            compiler_params=pltpu.CompilerParams(
                dimension_semantics=("parallel",),
                vmem_limit_bytes=vmem_limit),
            cost_estimate=cost,
        )(x_in, w1p, b1p, w2p, b2p)
    else:
        tk = cfg.tk
        vmem_need = (2 * tm * cfg.cin_p * 2
                     + 2 * cfg.cin_p * tk * 2
                     + 2 * tk * cfg.cout_p * 2
                     + 2 * 8 * (tk + cfg.cout_p) * 4
                     + 2 * tm * cfg.cout_p * out_bytes
                     + tm * cfg.cout_p * 4
                     + tm * tk * 4)
        vmem_limit = int(min(max(2 * vmem_need, 32 << 20), cfg.vmem_cap))
        wbufs = 3 if gen == 5 else None   # extra slab buffer on slow-HBM v5e

        def _wspec(shape, index_map, bufs):
            if bufs is None:
                return pl.BlockSpec(shape, index_map)
            return pl.BlockSpec(shape, index_map,
                                pipeline_mode=pl.Buffered(bufs))

        out2d = pl.pallas_call(
            _mlp_kernel_tiled,
            out_shape=jax.ShapeDtypeStruct((Mp, cfg.cout_p), x.dtype),
            grid_spec=pltpu.PrefetchScalarGridSpec(
                num_scalar_prefetch=0,
                grid=(num_m, cfg.num_k),
                in_specs=[
                    pl.BlockSpec((tm, cfg.cin_p), lambda i, k: (i, 0)),
                    _wspec((cfg.cin_p, tk), lambda i, k: (0, k), wbufs),
                    pl.BlockSpec((1, tk), lambda i, k: (0, k)),
                    _wspec((tk, cfg.cout_p), lambda i, k: (k, 0), wbufs),
                    pl.BlockSpec((1, cfg.cout_p), lambda i, k: (0, 0)),
                ],
                out_specs=pl.BlockSpec((tm, cfg.cout_p), lambda i, k: (i, 0)),
                scratch_shapes=[pltpu.VMEM((tm, cfg.cout_p), jnp.float32)],
            ),
            compiler_params=pltpu.CompilerParams(
                dimension_semantics=("parallel", "arbitrary"),
                vmem_limit_bytes=vmem_limit),
            cost_estimate=cost,
        )(x_in, w1p, b1p, w2p, b2p)

    return out2d[:M, :cfg.cout].reshape(B, L, cfg.cout)


def mlp_block(x, params, cfg):
    """x: (B, L, Cin); params from prepare_mlp_params()."""
    return _mlp_block_impl(x, *params, cfg=cfg)


def _reference(x, w1, b1, w2, b2):
    h = jnp.einsum("blc,cd->bld", x, w1) + b1
    h = jax.nn.gelu(h, approximate=False)
    return jnp.einsum("bld,de->ble", h, w2) + b2


if __name__ == "__main__":
    # Small shapes consistent with the module's forward: (B, L, C) tokens.
    B, L = 2, 8
    in_channels = 32
    inter_channels = 64
    out_channels = 32

    key = jax.random.PRNGKey(0)
    kx, kw1, kb1, kw2, kb2 = jax.random.split(key, 5)

    x = jax.random.normal(kx, (B, L, in_channels), dtype=jnp.float32)
    # PyTorch Linear weight is (out, in); we store the transposed (in, out).
    w1 = jax.random.normal(kw1, (in_channels, inter_channels), jnp.float32) * 0.02
    b1 = jax.random.normal(kb1, (inter_channels,), jnp.float32) * 0.02
    w2 = jax.random.normal(kw2, (inter_channels, out_channels), jnp.float32) * 0.02
    b2 = jax.random.normal(kb2, (out_channels,), jnp.float32) * 0.02

    # One-time padding / casting (model-load), then the fast per-call path.
    params, cfg = prepare_mlp_params(w1, b1, w2, b2)
    out = mlp_block(x, params, cfg)
    out = jax.block_until_ready(out)

    ref = _reference(x, w1, b1, w2, b2)
    assert out.shape == (B, L, out_channels)
    # bf16 MXU operands (f32 accumulation) + tanh-GELU -> loosened tolerance.
    assert jnp.allclose(out, ref, atol=2e-2, rtol=2e-2), "mismatch vs reference"

    print("KERNEL_OK")
</pallas_src>

<mosaic_0001>
module attributes {stable_mosaic.version = 11 : i64} {
  func.func @_mlp_kernel_resident(%arg0: i32, %arg1: memref<16x128xbf16, #tpu.memory_space<vmem>>, %arg2: memref<128x128xbf16, #tpu.memory_space<vmem>>, %arg3: memref<1x128xf32, #tpu.memory_space<vmem>>, %arg4: memref<128x128xbf16, #tpu.memory_space<vmem>>, %arg5: memref<1x128xf32, #tpu.memory_space<vmem>>, %arg6: memref<16x128xf32, #tpu.memory_space<vmem>>) attributes {dimension_semantics = [#tpu.dimension_semantics<parallel>], iteration_bounds = array<i64: 1>, scalar_prefetch = 0 : i64, scratch_operands = 0 : i64, tpu.core_type = #tpu.core_type<tc>, window_params = [{transform_indices = @transform_0, window_bounds = array<i64: 16, 128>}, {pipeline_mode = #tpu.pipeline_mode<synchronous>, transform_indices = @transform_1, window_bounds = array<i64: 128, 128>}, {pipeline_mode = #tpu.pipeline_mode<synchronous>, transform_indices = @transform_2, window_bounds = array<i64: 1, 128>}, {pipeline_mode = #tpu.pipeline_mode<synchronous>, transform_indices = @transform_3, window_bounds = array<i64: 128, 128>}, {pipeline_mode = #tpu.pipeline_mode<synchronous>, transform_indices = @transform_4, window_bounds = array<i64: 1, 128>}, {transform_indices = @transform_5, window_bounds = array<i64: 16, 128>}]} {
    %c0 = arith.constant 0 : index
    %c0_0 = arith.constant 0 : index
    %0 = vector.load %arg1[%c0, %c0_0] : memref<16x128xbf16, #tpu.memory_space<vmem>>, vector<16x128xbf16>
    %c0_1 = arith.constant 0 : index
    %c0_2 = arith.constant 0 : index
    %1 = vector.load %arg2[%c0_1, %c0_2] : memref<128x128xbf16, #tpu.memory_space<vmem>>, vector<128x128xbf16>
    %cst = arith.constant dense<0.000000e+00> : vector<16x128xf32>
    %2 = tpu.matmul %0, %1, %cst {dimension_numbers = #tpu.dot_dimension_numbers<[1], [0], [0], [1], [0, 0, 1, 1], [], []>} : vector<16x128xbf16>, vector<128x128xbf16>, vector<16x128xf32> -> vector<16x128xf32>
    %c0_3 = arith.constant 0 : index
    %c0_4 = arith.constant 0 : index
    %3 = vector.load %arg3[%c0_3, %c0_4] : memref<1x128xf32, #tpu.memory_space<vmem>>, vector<1x128xf32>
    %4 = vector.broadcast %3 : vector<1x128xf32> to vector<16x128xf32>
    %5 = arith.addf %2, %4 : vector<16x128xf32>
    %6 = arith.mulf %5, %5 : vector<16x128xf32>
    %7 = arith.mulf %5, %6 : vector<16x128xf32>
    %cst_5 = arith.constant 4.471500e-02 : f32
    %8 = vector.broadcast %cst_5 : f32 to vector<16x128xf32>
    %9 = arith.mulf %8, %7 : vector<16x128xf32>
    %10 = arith.addf %5, %9 : vector<16x128xf32>
    %cst_6 = arith.constant 0.797884583 : f32
    %11 = vector.broadcast %cst_6 : f32 to vector<16x128xf32>
    %12 = arith.mulf %11, %10 : vector<16x128xf32>
    %13 = math.tanh %12 : vector<16x128xf32>
    %cst_7 = arith.constant 1.000000e+00 : f32
    %14 = vector.broadcast %cst_7 : f32 to vector<16x128xf32>
    %15 = arith.addf %14, %13 : vector<16x128xf32>
    %cst_8 = arith.constant 5.000000e-01 : f32
    %16 = vector.broadcast %cst_8 : f32 to vector<16x128xf32>
    %17 = arith.mulf %16, %15 : vector<16x128xf32>
    %18 = arith.mulf %5, %17 : vector<16x128xf32>
    %19 = arith.truncf %18 : vector<16x128xf32> to vector<16x128xbf16>
    %c0_9 = arith.constant 0 : index
    %c0_10 = arith.constant 0 : index
    %20 = vector.load %arg4[%c0_9, %c0_10] : memref<128x128xbf16, #tpu.memory_space<vmem>>, vector<128x128xbf16>
    %cst_11 = arith.constant dense<0.000000e+00> : vector<16x128xf32>
    %21 = tpu.matmul %19, %20, %cst_11 {dimension_numbers = #tpu.dot_dimension_numbers<[1], [0], [0], [1], [0, 0, 1, 1], [], []>} : vector<16x128xbf16>, vector<128x128xbf16>, vector<16x128xf32> -> vector<16x128xf32>
    %c0_12 = arith.constant 0 : index
    %c0_13 = arith.constant 0 : index
    %22 = vector.load %arg5[%c0_12, %c0_13] : memref<1x128xf32, #tpu.memory_space<vmem>>, vector<1x128xf32>
    %23 = vector.broadcast %22 : vector<1x128xf32> to vector<16x128xf32>
    %24 = arith.addf %21, %23 : vector<16x128xf32>
    %c0_14 = arith.constant 0 : index
    %c0_15 = arith.constant 0 : index
    %25 = vector.load %arg6[%c0_14, %c0_15] : memref<16x128xf32, #tpu.memory_space<vmem>>, vector<16x128xf32>
    tpu.vector_store %arg6[%c0_14, %c0_15], %24 {strides = array<i32>} : memref<16x128xf32, #tpu.memory_space<vmem>>, vector<16x128xf32>,
    return
  }
  func.func @transform_0(%arg0: i32) -> (i32, i32) {
    %c0_i32 = arith.constant 0 : i32
    %c0_i32_0 = arith.constant 0 : i32
    return %arg0, %c0_i32 : i32, i32
  }
  func.func @transform_1(%arg0: i32) -> (i32, i32) {
    %c0_i32 = arith.constant 0 : i32
    %c0_i32_0 = arith.constant 0 : i32
    %c0_i32_1 = arith.constant 0 : i32
    return %c0_i32, %c0_i32_0 : i32, i32
  }
  func.func @transform_2(%arg0: i32) -> (i32, i32) {
    %c0_i32 = arith.constant 0 : i32
    %c0_i32_0 = arith.constant 0 : i32
    %c0_i32_1 = arith.constant 0 : i32
    return %c0_i32, %c0_i32_0 : i32, i32
  }
  func.func @transform_3(%arg0: i32) -> (i32, i32) {
    %c0_i32 = arith.constant 0 : i32
    %c0_i32_0 = arith.constant 0 : i32
    %c0_i32_1 = arith.constant 0 : i32
    return %c0_i32, %c0_i32_0 : i32, i32
  }
  func.func @transform_4(%arg0: i32) -> (i32, i32) {
    %c0_i32 = arith.constant 0 : i32
    %c0_i32_0 = arith.constant 0 : i32
    %c0_i32_1 = arith.constant 0 : i32
    return %c0_i32, %c0_i32_0 : i32, i32
  }
  func.func @transform_5(%arg0: i32) -> (i32, i32) {
    %c0_i32 = arith.constant 0 : i32
    %c0_i32_0 = arith.constant 0 : i32
    return %arg0, %c0_i32 : i32, i32
  }
}

</mosaic_0001>

<bundles_post_ra>
// kernel: _mlp_block_impl.1
= control target key start
LH: loop header
LB: loop body
LE: loop exit
PB: predicated region body
PF: predicated region fallthrough
CT: control target
= control target key end

     0   :  { %10 = vsyncpa [#allocation3], 0  ;;  %s535_s0 = inlined_call_operand.vmem [shape: bf16[16,128], index: 0, kind: input, shape index: {}]   ;;  %s536_s1 = inlined_call_operand.hbm [shape: bf16[128,128], index: 1, kind: input, shape index: {}]   ;;  %s537_s2 = inlined_call_operand.vmem [shape: f32[1,128], index: 2, kind: input, shape index: {}]   ;;  %s538_s3 = inlined_call_operand.hbm [shape: bf16[128,128], index: 3, kind: input, shape index: {}]   ;;  %s539_s4 = inlined_call_operand.vmem [shape: f32[1,128], index: 4, kind: input, shape index: {}]   ;;  %s540_s5 = inlined_call_operand.vmem [shape: f32[16,128], index: 5, kind: output, shape index: {}]  }
   0x1   :  { %11 = vsyncpa [#allocation5], 0  ;;  %s460_s18 = smov [#allocation2]   ;;  %s412_s22 = scalar_lea.hbm %s536_s1, 1024 }
   0x2   :  { %s19_s19 = sshll.u32 %s460_s18, 4  ;;  %p413_p0 = scmp.ne.s32.totalorder %s536_s1, %s412_s22  ;;  %s20_s19 = int_to_ptr.vmem [resolvable:$true] %s19_s19 }
   0x3   :  { %p416_p1 = scmp.lt.u32.totalorder %s412_s22, %s536_s1 }
   0x5   :  { %p418_p2 = pnand %p416_p1, %p413_p0 }
   0x7   :  { %421 = shalt.err (!%p418_p2)
}
   0x8   :  { %s422_s27 = scalar_lea.vmem %s20_s19, 1024  ;;  %p427_p4 = scmp.lt.s32.totalorder %s20_s19, %s20_s19 }
   0x9   :  { %p423_p3 = scmp.ne.s32.totalorder %s20_s19, %s422_s27  ;;  %p428_p5 = scmp.lt.s32.totalorder %s422_s27, %s422_s27 }
   0xb   :  { %p429_p6 = por %p428_p5, %p427_p4 }
   0xd   :  { %p430_p7 = pnand %p429_p6, %p423_p3 }
   0xf   :  { %433 = shalt.err (!%p430_p7)
}
  0x10   :  { %s461_s28 = smov 64   ;;  %s462_s29 = smov 4  }
  0x11   :  { %25 = dma.hbm_to_vmem [thread:$0]  %s536_s1, 1024, %s20_s19, [#allocation3], %s461_s28, %s461_s28, %s462_s29  }
  0x12   :  { %s463_s7 = smov [#allocation4]   ;;  %s434_s11 = scalar_lea.hbm %s538_s3, 1024 }
  0x13   :  { %s33_s8 = sshll.u32 %s463_s7, 4  ;;  %p435_p8 = scmp.ne.s32.totalorder %s538_s3, %s434_s11  ;;  %s34_s8 = int_to_ptr.vmem [resolvable:$true] %s33_s8 }
  0x14   :  { %p438_p9 = scmp.lt.u32.totalorder %s434_s11, %s538_s3 }
  0x16   :  { %p440_p10 = pnand %p438_p9, %p435_p8 }
  0x18   :  { %443 = shalt.err (!%p440_p10)
}
  0x19   :  { %s444_s16 = scalar_lea.vmem %s34_s8, 1024  ;;  %p449_p12 = scmp.lt.s32.totalorder %s34_s8, %s34_s8 }
  0x1a   :  { %p445_p11 = scmp.ne.s32.totalorder %s34_s8, %s444_s16  ;;  %p450_p13 = scmp.lt.s32.totalorder %s444_s16, %s444_s16 }
  0x1c   :  { %p451_p0 = por %p450_p13, %p449_p12 }
  0x1e   :  { %p452_p1 = pnand %p451_p0, %p445_p11 }
  0x20   :  { %455 = shalt.err (!%p452_p1)
}
  0x21   :  { %39 = dma.hbm_to_vmem [thread:$0]  %s538_s3, 1024, %s34_s8, [#allocation5], %s461_s28, %s461_s28, %s462_s29  }
  0x22   :  { %456 = dma.done.wait [#allocation3], 1024  }
  0x23   :  { %457 = vsyncadd [#allocation3], 4294966272 }
  0x24   :  { %458 = dma.done.wait [#allocation5], 1024  }
  0x25   :  { %459 = vsyncadd [#allocation5], 4294966272  ;;  %v464_v0 = vmov 0.0   ;;  %vm465_vm0 = vmmov 0   ;;  %v391_v1 = vld [vmem:[#allocation2] sm:$0xff]   ;;  %v392_v2 = vld [vmem:[#allocation2 + $0x8] sm:$0xff]  }
  0x26   :  { %345 = vmatprep.subr.bf16.mxu0 %v464_v0  ;;  %361 = vmatprep.mubr.msk.bf16.mxu0 %vm465_vm0, %v464_v0  ;;  %v393_v3 = vld [vmem:[#allocation2 + $0x10] sm:$0xff]   ;;  %v394_v4 = vld [vmem:[#allocation2 + $0x18] sm:$0xff]   ;;  %v395_v5 = vld [vmem:[#allocation2 + $0x20] sm:$0xff]  }
  0x27   :  { %365 = vmatprep.subr.bf16.mxu1 %v464_v0  ;;  %381 = vmatprep.mubr.msk.bf16.mxu1 %vm465_vm0, %v464_v0  ;;  %v396_v6 = vld [vmem:[#allocation2 + $0x28] sm:$0xff]   ;;  %v397_v7 = vld [vmem:[#allocation2 + $0x30] sm:$0xff]   ;;  %v398_v8 = vld [vmem:[#allocation2 + $0x38] sm:$0xff]  }
  0x28   :  { %346 = vmatpush3.bf16.msra.mxu0 %v391_v1  ;;  %v399_v9 = vld [vmem:[%s535_s0] sm:$0xff]   ;;  %v401_v11 = vld [vmem:[#allocation4 + $0x8] sm:$0xff]   ;;  %v402_v12 = vld [vmem:[#allocation4 + $0x10] sm:$0xff]  }
  0x29   :  { %347 = vmatprep.subr.bf16.mxu0 %v464_v0  ;;  %v400_v10 = vld [vmem:[#allocation4] sm:$0xff]   ;;  %v403_v13 = vld [vmem:[#allocation4 + $0x18] sm:$0xff]   ;;  %v405_v15 = vld [vmem:[#allocation4 + $0x28] sm:$0xff]  }
  0x2a   :  { %366 = vmatpush3.bf16.msra.mxu1 %v400_v10  ;;  %v404_v14 = vld [vmem:[#allocation4 + $0x20] sm:$0xff]   ;;  %v406_v16 = vld [vmem:[#allocation4 + $0x30] sm:$0xff]   ;;  %v407_v17 = vld [vmem:[#allocation4 + $0x38] sm:$0xff]  }
  0x2b   :  { %367 = vmatprep.subr.bf16.mxu1 %v464_v0  ;;  %v308_v18 = vld [vmem:[%s537_s2] ss:$0 sm:$0xff] }
  0x2c   :  { %348 = vmatpush3.bf16.msra.mxu0 %v392_v2  ;;  %v318_v44 = vld [vmem:[%s539_s4] ss:$0 sm:$0xff] }
  0x2d   :  { %349 = vmatprep.subr.bf16.mxu0 %v464_v0 }
  0x2e   :  { %368 = vmatpush3.bf16.msra.mxu1 %v401_v11 }
  0x2f   :  { %369 = vmatprep.subr.bf16.mxu1 %v464_v0 }
  0x30   :  { %350 = vmatpush3.bf16.msra.mxu0 %v393_v3 }
  0x31   :  { %351 = vmatprep.subr.bf16.mxu0 %v464_v0 }
  0x32   :  { %370 = vmatpush3.bf16.msra.mxu1 %v402_v12 }
  0x33   :  { %371 = vmatprep.subr.bf16.mxu1 %v464_v0 }
  0x34   :  { %352 = vmatpush3.bf16.msra.mxu0 %v394_v4 }
  0x35   :  { %353 = vmatprep.subr.bf16.mxu0 %v464_v0 }
  0x36   :  { %372 = vmatpush3.bf16.msra.mxu1 %v403_v13 }
  0x37   :  { %373 = vmatprep.subr.bf16.mxu1 %v464_v0 }
  0x38   :  { %354 = vmatpush3.bf16.msra.mxu0 %v395_v5 }
  0x39   :  { %355 = vmatprep.subr.bf16.mxu0 %v464_v0 }
  0x3a   :  { %374 = vmatpush3.bf16.msra.mxu1 %v404_v14 }
  0x3b   :  { %375 = vmatprep.subr.bf16.mxu1 %v464_v0 }
  0x3c   :  { %356 = vmatpush3.bf16.msra.mxu0 %v396_v6 }
  0x3d   :  { %357 = vmatprep.subr.bf16.mxu0 %v464_v0 }
  0x3e   :  { %376 = vmatpush3.bf16.msra.mxu1 %v405_v15 }
  0x3f   :  { %377 = vmatprep.subr.bf16.mxu1 %v464_v0 }
  0x40   :  { %358 = vmatpush3.bf16.msra.mxu0 %v397_v7 }
  0x41   :  { %359 = vmatprep.subr.bf16.mxu0 %v464_v0 }
  0x42   :  { %378 = vmatpush3.bf16.msra.mxu1 %v406_v16 }
  0x43   :  { %379 = vmatprep.subr.bf16.mxu1 %v464_v0 }
  0x44   :  { %360 = vmatpush3.bf16.msra.mxu0 %v398_v8 }
  0x46   :  { %380 = vmatpush3.bf16.msra.mxu1 %v407_v17 }
  0x47   :  { %362 = vmatmul.mubr.bf16.vlgmr.msra.gmra.mrb[0].mxu0 %v399_v9 }
 0x11a   :  { %v162_v19 = vpop.f32.mrb[0].mxu0 }
 0x11b   :  { %v163_v20 = vadd.f32 %v308_v18, %v162_v19  ;;  %v363_v21 = vpop.f32.mrb[1].mxu0 }
 0x11c   :  { %v165_v22 = vpop.f32.mrb[2].mxu0 }
 0x11d   :  { %v169_v23 = vmul.f32 %v163_v20, %v163_v20  ;;  %v166_v24 = vadd.f32 %v308_v18, %v165_v22  ;;  %v364_v25 = vpop.f32.mrb[3].mxu0 }
 0x11f   :  { %v171_v26 = vmul.f32 %v169_v23, %v163_v20  ;;  %v170_v27 = vmul.f32 %v166_v24, %v166_v24 }
 0x121   :  { %v173_v28 = vmul.f32 0.044715, %v171_v26  ;;  %v172_v29 = vmul.f32 %v170_v27, %v166_v24 }
 0x123   :  { %v175_v30 = vadd.f32 %v173_v28, %v163_v20  ;;  %v174_v31 = vmul.f32 0.044715, %v172_v29 }
 0x125   :  { %v177_v32 = vmul.f32 0.7978846, %v175_v30  ;;  %v176_v33 = vadd.f32 %v174_v31, %v166_v24 }
 0x127   :  { %408 = vtanh.f32 %v177_v32  ;;  %v178_v34 = vmul.f32 0.7978846, %v176_v33 }
 0x129   :  { %410 = vtanh.f32 %v178_v34 }
 0x131   :  { %v409_v35 = vpop.eup %408 }
 0x132   :  { %v181_v36 = vadd.f32 1.0, %v409_v35 }
 0x133   :  { %v411_v37 = vpop.eup %410 }
 0x134   :  { %v182_v38 = vadd.f32 1.0, %v411_v37  ;;  %v183_v39 = vmul.f32 0.5, %v181_v36 }
 0x136   :  { %v184_v40 = vmul.f32 0.5, %v182_v38  ;;  %v185_v41 = vmul.f32 %v183_v39, %v163_v20 }
 0x138   :  { %v186_v42 = vmul.f32 %v184_v40, %v166_v24 }
 0x13a   :  { %v187_v43 = vpack.c.bf16 %v186_v42, %v185_v41 }
 0x13c   :  { %382 = vmatmul.mubr.bf16.vlgmr.msra.gmra.mrb[0].mxu1 %v187_v43 }
 0x20f   :  { %v293_v45 = vpop.f32.mrb[0].mxu1 }
 0x210   :  { %v294_v46 = vadd.f32 %v318_v44, %v293_v45  ;;  %v383_v47 = vpop.f32.mrb[1].mxu1 }
 0x211   :  { %v296_v48 = vpop.f32.mrb[2].mxu1 }
 0x212   :  { %300 = vst [vmem:[%s540_s5] sm:$0xff] %v294_v46  ;;  %v297_v49 = vadd.f32 %v318_v44, %v296_v48  ;;  %v384_v50 = vpop.f32.mrb[3].mxu1 }
 0x214   :  { %301 = vst [vmem:[%s540_s5 + $0x8] sm:$0xff] %v297_v49 }
 0x215   :  { %306 = vsyncpa [#allocation3], 1 }
 0x216   :  { %307 = vsyncpa [#allocation5], 1 }

</bundles_post_ra>
